<compile_context>
chip_gen: v6e
topology: v6e:2x2x1
jax: 0.10.0
libtpu: 0.0.40
codegen_flags: <defaults>
</compile_context>

<pallas_src>
import functools
import math

import jax
import jax.numpy as jnp
from jax.experimental import pallas as pl
from jax.experimental.pallas import tpu as pltpu


_CHUNK_TARGET_BYTES = 1 << 20   # ~1 MiB live f32 slab per inner accumulation step


# --------------------------------------------------------------------------
# Small helpers
# --------------------------------------------------------------------------
def _floor_mult(x, m):
    return (x // m) * m


def _ceil_mult(x, m):
    return ((x + m - 1) // m) * m


def _sublane_multiple(dtype):
    # Packed-vreg sublane count: 8 rows (4-byte), 16 (2-byte), 32 (1-byte).
    return max(8, 32 // jnp.dtype(dtype).itemsize)


def _vmem_capacity_bytes():
    try:
        cap = int(getattr(pltpu.get_tpu_info(), "vmem_capacity_bytes", 0))
        if cap > 0:
            return cap
    except Exception:
        pass
    return 64 * 1024 * 1024          # conservative (v7x per-TensorCore)


def _target_block_bytes(cap):
    # ~4 MiB blocks on 64 MiB-VMEM parts (v7x), ~8 MiB on 128 MiB parts.
    return (4 << 20) if cap <= (80 << 20) else (8 << 20)


def _vmem_limit_bytes(working_bytes, cap):
    needed = working_bytes + (8 << 20)    # headroom for Mosaic internal scratch
    return int(min(max(needed, 32 << 20), (cap * 3) // 4))


def _pick_chunk(tr, unit, f32_bytes_per_row):
    """Rows of the reduced block axis to process per inner accumulation step."""
    if tr <= unit or (tr % unit) != 0:
        return tr
    max_rows = max(unit, _floor_mult(
        _CHUNK_TARGET_BYTES // max(f32_bytes_per_row, 1), unit))
    if max_rows >= tr:
        return tr
    for c in range(max_rows, unit - 1, -unit):
        if tr % c == 0:
            return c
    return tr


# --------------------------------------------------------------------------
# Kernel (shared by both layouts; the reduced block axis is always axis 1)
# --------------------------------------------------------------------------
def _mean_kernel(x_ref, o_ref, *acc_scratch,
                 r_axis, inv_r, r_total, tr, r_chunk, mask_r):
    """Accumulate f32 partial sums over block axis 1; scale by 1/R on the last R step."""
    acc_ref = acc_scratch[0] if acc_scratch else o_ref   # f32 output: accumulate in place
    r_idx = pl.program_id(r_axis)
    n_r = pl.num_programs(r_axis)
    n_chunks = tr // r_chunk
    trailing = (slice(None),) * (len(x_ref.shape) - 2)

    @pl.when(r_idx == 0)
    def _():
        acc_ref[...] = jnp.zeros_like(acc_ref)

    def add_slab(xs, r_base, masked):
        xs = xs.astype(jnp.float32)
        if masked:
            rr = (r_idx * tr + r_base
                  + jax.lax.broadcasted_iota(jnp.int32, xs.shape, 1))
            xs = jnp.where(rr < r_total, xs, 0.0)
        acc_ref[...] += jnp.sum(xs, axis=1)

    def accumulate(masked):
        if n_chunks == 1:
            add_slab(x_ref[...], 0, masked)
        else:
            def body(c, carry):
                start = pl.multiple_of(c * r_chunk, r_chunk)
                idx = (slice(None), pl.ds(start, r_chunk)) + trailing
                add_slab(x_ref[idx], start, masked)
                return carry
            jax.lax.fori_loop(0, n_chunks, body, 0, unroll=n_chunks <= 8)

    if mask_r:
        # Only the last R step pays the iota/compare/select; the hot path is a
        # plain cast + add.
        is_last = r_idx == n_r - 1

        @pl.when(jnp.logical_not(is_last))
        def _():
            accumulate(False)

        @pl.when(is_last)
        def _():
            accumulate(True)
    else:
        accumulate(False)

    @pl.when(r_idx == n_r - 1)
    def _():
        o_ref[...] = (acc_ref[...] * inv_r).astype(o_ref.dtype)


# --------------------------------------------------------------------------
# Tile selection
# --------------------------------------------------------------------------
def _choose_tiles_3d(P, R, S, itemsize, sub, target_bytes):
    budget = max(target_bytes // itemsize, sub * 128)
    tp_min = min(P, sub)
    r_min = min(R, sub)

    # 1) Last axis: keep full S whenever a minimal (tp_min, r_min, S) block
    #    fits, so each p-row DMA is one long contiguous run; otherwise tile S
    #    in lane multiples.
    if S <= 128 or tp_min * r_min * S <= budget:
        TS = S
    else:
        TS = min(S, max(128, _floor_mult(budget // (tp_min * r_min), 128)))

    # 2) Reduction axis: fill the budget at minimal TP; splitting R across the
    #    grid is free thanks to the resident accumulator.
    max_tr = budget // max(tp_min * TS, 1)
    if max_tr >= R:
        TR = R
    else:
        TR = min(R, max(min(R, sub), _floor_mult(max_tr, sub)))

    # 3) Batch axis: whatever budget remains, in packed-sublane multiples.
    max_tp = budget // max(TR * TS, 1)
    if max_tp >= P:
        TP = P
    else:
        tp = max(tp_min, _floor_mult(max_tp, 8))
        if tp > sub:
            tp = max(sub, _floor_mult(tp, sub))
        TP = min(P, tp)

    # 4) If the parallel (P, S) grid collapsed to one block, split it so both
    #    TensorCores get work on v7x (harmless on single-core v5e/v6e).
    if TP == P and TS == S:
        if P >= 2 * sub:
            cand = _ceil_mult((P + 1) // 2, sub)
            if cand < P:
                TP = cand
        elif S >= 256:
            cand = _ceil_mult((S + 1) // 2, 128)
            if cand < S:
                TS = cand
    return TP, TR, TS


def _choose_tiles_2d(P, R, itemsize, target_bytes):
    budget = max(target_bytes // itemsize, 128 * 128)
    tp_min = min(P, 128)                  # output lanes: multiple of 128 (or full P)

    max_tr = max(128, budget // tp_min)
    if R <= max_tr:
        TR = R
    else:
        TR = max(128, _floor_mult(max_tr, 128))

    max_tp = budget // max(TR, 1)
    if max_tp >= P:
        TP = P
    else:
        TP = min(P, max(128, _floor_mult(max_tp, 128)))

    # Split the single parallel axis when it collapsed to one block (v7x).
    if TP == P and P >= 256:
        cand = _ceil_mult((P + 1) // 2, 128)
        if cand < P:
            TP = cand
    return TP, TR


# --------------------------------------------------------------------------
# pallas_call builders
# --------------------------------------------------------------------------
def _mean_pallas_3d(x3, target_bytes, cap):
    P, R, S = x3.shape
    dtype = x3.dtype
    itemsize = jnp.dtype(dtype).itemsize
    sub = _sublane_multiple(dtype)
    TP, TR, TS = _choose_tiles_3d(P, R, S, itemsize, sub, target_bytes)

    grid = (pl.cdiv(P, TP), pl.cdiv(S, TS), pl.cdiv(R, TR))
    mask_r = (R % TR) != 0
    r_chunk = _pick_chunk(TR, sub, TP * TS * 4)
    use_scratch = dtype != jnp.float32

    kernel = functools.partial(
        _mean_kernel, r_axis=2, inv_r=1.0 / R, r_total=R,
        tr=TR, r_chunk=r_chunk, mask_r=mask_r)

    scratch = [pltpu.VMEM((TP, TS), jnp.float32)] if use_scratch else []
    working = (2 * TP * TR * TS * itemsize + 2 * TP * TS * itemsize
               + (TP * TS * 4 if use_scratch else 0))

    return pl.pallas_call(
        kernel,
        out_shape=jax.ShapeDtypeStruct((P, S), dtype),
        grid_spec=pltpu.PrefetchScalarGridSpec(
            num_scalar_prefetch=0,
            grid=grid,
            in_specs=[pl.BlockSpec((TP, TR, TS), lambda p, s, r: (p, r, s))],
            out_specs=pl.BlockSpec((TP, TS), lambda p, s, r: (p, s)),
            scratch_shapes=scratch),
        compiler_params=pltpu.CompilerParams(
            dimension_semantics=("parallel", "parallel", "arbitrary"),
            vmem_limit_bytes=_vmem_limit_bytes(working, cap)),
    )(x3)


def _mean_pallas_2d(x2, target_bytes, cap):
    """Lane-dense path for reducing the last (innermost) axis: x2 is (P, R)."""
    P, R = x2.shape
    dtype = x2.dtype
    itemsize = jnp.dtype(dtype).itemsize
    TP, TR = _choose_tiles_2d(P, R, itemsize, target_bytes)

    grid = (pl.cdiv(P, TP), pl.cdiv(R, TR))
    mask_r = (R % TR) != 0
    r_chunk = _pick_chunk(TR, 128, TP * 4)
    use_scratch = dtype != jnp.float32

    kernel = functools.partial(
        _mean_kernel, r_axis=1, inv_r=1.0 / R, r_total=R,
        tr=TR, r_chunk=r_chunk, mask_r=mask_r)

    scratch = [pltpu.VMEM((TP,), jnp.float32)] if use_scratch else []
    working = (2 * TP * TR * itemsize + 2 * TP * itemsize
               + (TP * 4 if use_scratch else 0))

    return pl.pallas_call(
        kernel,
        out_shape=jax.ShapeDtypeStruct((P,), dtype),
        grid_spec=pltpu.PrefetchScalarGridSpec(
            num_scalar_prefetch=0,
            grid=grid,
            in_specs=[pl.BlockSpec((TP, TR), lambda p, r: (p, r))],
            out_specs=pl.BlockSpec((TP,), lambda p, r: (p,)),
            scratch_shapes=scratch),
        compiler_params=pltpu.CompilerParams(
            dimension_semantics=("parallel", "arbitrary"),
            vmem_limit_bytes=_vmem_limit_bytes(working, cap)),
    )(x2)


# --------------------------------------------------------------------------
# Public forward
# --------------------------------------------------------------------------
def pap_forward(x, pap_dim, dropout_ratio=0.0, training=False):
    """PAP forward: mean over `pap_dim`, then dropout (identity in eval mode)."""
    shape = x.shape
    ndim = len(shape)
    if pap_dim < 0:
        pap_dim += ndim
    if not (0 <= pap_dim < ndim):
        raise ValueError(f"pap_dim out of range for rank-{ndim} input")
    if not jnp.issubdtype(x.dtype, jnp.floating):
        # torch.mean rejects integer/bool inputs; do the same.
        raise TypeError(f"PAP (torch.mean) requires a floating dtype, got {x.dtype}")

    P = int(math.prod(shape[:pap_dim])) if pap_dim > 0 else 1
    R = int(shape[pap_dim])
    S = int(math.prod(shape[pap_dim + 1:])) if pap_dim + 1 < ndim else 1
    out_shape = shape[:pap_dim] + shape[pap_dim + 1:]

    if R == 1:
        out = x.reshape(out_shape)          # mean over a size-1 axis is a reshape
    else:
        cap = _vmem_capacity_bytes()
        target = _target_block_bytes(cap)
        if S == 1:
            try:
                out_flat = _mean_pallas_2d(x.reshape(P, R), target, cap)
            except Exception:
                # Safety net: fall back to the generic layout if the lane-dense
                # lowering is unavailable on this compiler version.
                out_flat = _mean_pallas_3d(x.reshape(P, R, 1), target, cap)
        else:
            # TODO(synk): 1 < S < 128 still emits lane-partial output stores; a
            # packed-output layout would require an extra transposed input pass.
            out_flat = _mean_pallas_3d(x.reshape(P, R, S), target, cap)
        out = out_flat.reshape(out_shape)

    if training and dropout_ratio > 0.0:
        # TODO(synk): training-mode dropout needs an RNG stream matching
        # PyTorch's; only eval-mode (identity) dropout is implemented here.
        raise NotImplementedError("training-mode dropout not implemented")
    return out


if __name__ == "__main__":
    key = jax.random.PRNGKey(0)
    # Small NCHW-like input, as the PyTorch module would typically receive.
    x = jax.random.normal(key, (2, 4, 16, 16), dtype=jnp.float32)

    pap_dim = 1          # reduce over the channel axis
    dropout_ratio = 0.5  # inactive in eval mode

    out = jax.block_until_ready(pap_forward(x, pap_dim, dropout_ratio, training=False))
    ref = jnp.mean(x, axis=pap_dim)
    assert out.shape == ref.shape, (out.shape, ref.shape)
    assert jnp.allclose(out, ref, atol=1e-5, rtol=1e-5), "f32 mismatch vs reference"

    # bf16 input: the kernel accumulates in f32 and casts on the final store.
    x_bf16 = x.astype(jnp.bfloat16)
    out_bf16 = jax.block_until_ready(pap_forward(x_bf16, pap_dim, dropout_ratio))
    ref_bf16 = jnp.mean(x_bf16.astype(jnp.float32), axis=pap_dim)
    assert out_bf16.dtype == jnp.bfloat16
    assert jnp.allclose(out_bf16.astype(jnp.float32), ref_bf16,
                        atol=2e-2, rtol=2e-2), "bf16 mismatch vs reference"

    # Mean over the last axis exercises the lane-dense (S == 1) path.
    out_last = jax.block_until_ready(pap_forward(x, -1, dropout_ratio))
    ref_last = jnp.mean(x, axis=-1)
    assert out_last.shape == ref_last.shape, (out_last.shape, ref_last.shape)
    assert jnp.allclose(out_last, ref_last, atol=1e-5, rtol=1e-5), \
        "last-axis mismatch vs reference"

    print("KERNEL_OK")
</pallas_src>

<mosaic_0001>
module attributes {stable_mosaic.version = 11 : i64} {
  func.func @_mean_kernel(%arg0: i32, %arg1: i32, %arg2: i32, %arg3: memref<2x4x128xf32, #tpu.memory_space<vmem>>, %arg4: memref<2x128xf32, #tpu.memory_space<vmem>>) attributes {dimension_semantics = [#tpu.dimension_semantics<parallel>, #tpu.dimension_semantics<parallel>, #tpu.dimension_semantics<arbitrary>], iteration_bounds = array<i64: 1, 2, 1>, scalar_prefetch = 0 : i64, scratch_operands = 0 : i64, tpu.core_type = #tpu.core_type<tc>, window_params = [{transform_indices = @transform_0, window_bounds = array<i64: 2, 4, 128>}, {transform_indices = @transform_1, window_bounds = array<i64: 2, 128>}]} {
    %c0_i32 = arith.constant 0 : i32
    %0 = arith.cmpi eq, %arg2, %c0_i32 : i32
    %1 = arith.extui %0 : i1 to i32
    %c0_i32_0 = arith.constant 0 : i32
    %2 = arith.cmpi ne, %1, %c0_i32_0 : i32
    scf.if %2 {
      %cst_9 = arith.constant 0.000000e+00 : f32
      %11 = vector.broadcast %cst_9 : f32 to vector<2x128xf32>
      %c0_10 = arith.constant 0 : index
      %c0_11 = arith.constant 0 : index
      %12 = vector.load %arg4[%c0_10, %c0_11] : memref<2x128xf32, #tpu.memory_space<vmem>>, vector<2x128xf32>
      tpu.vector_store %arg4[%c0_10, %c0_11], %11 {strides = array<i32>} : memref<2x128xf32, #tpu.memory_space<vmem>>, vector<2x128xf32>,
    } else {
    }
    %c0 = arith.constant 0 : index
    %c0_1 = arith.constant 0 : index
    %c0_2 = arith.constant 0 : index
    %3 = vector.load %arg3[%c0, %c0_1, %c0_2] : memref<2x4x128xf32, #tpu.memory_space<vmem>>, vector<2x4x128xf32>
    %c0_3 = arith.constant 0 : index
    %c0_4 = arith.constant 0 : index
    %4 = vector.load %arg4[%c0_3, %c0_4] : memref<2x128xf32, #tpu.memory_space<vmem>>, vector<2x128xf32>
    %cst = arith.constant dense<0.000000e+00> : vector<2x128xf32>
    %5 = vector.multi_reduction <add>, %3, %cst [1] : vector<2x4x128xf32> to vector<2x128xf32>
    %6 = arith.addf %4, %5 : vector<2x128xf32>
    %c0_5 = arith.constant 0 : index
    %c0_6 = arith.constant 0 : index
    %7 = vector.load %arg4[%c0_5, %c0_6] : memref<2x128xf32, #tpu.memory_space<vmem>>, vector<2x128xf32>
    tpu.vector_store %arg4[%c0_5, %c0_6], %6 {strides = array<i32>} : memref<2x128xf32, #tpu.memory_space<vmem>>, vector<2x128xf32>,
    %c0_i32_7 = arith.constant 0 : i32
    %8 = arith.cmpi eq, %arg2, %c0_i32_7 : i32
    %9 = arith.extui %8 : i1 to i32
    %c0_i32_8 = arith.constant 0 : i32
    %10 = arith.cmpi ne, %9, %c0_i32_8 : i32
    scf.if %10 {
      %c0_9 = arith.constant 0 : index
      %c0_10 = arith.constant 0 : index
      %11 = vector.load %arg4[%c0_9, %c0_10] : memref<2x128xf32, #tpu.memory_space<vmem>>, vector<2x128xf32>
      %cst_11 = arith.constant 2.500000e-01 : f32
      %12 = vector.broadcast %cst_11 : f32 to vector<2x128xf32>
      %13 = arith.mulf %11, %12 : vector<2x128xf32>
      %c0_12 = arith.constant 0 : index
      %c0_13 = arith.constant 0 : index
      %14 = vector.load %arg4[%c0_12, %c0_13] : memref<2x128xf32, #tpu.memory_space<vmem>>, vector<2x128xf32>
      tpu.vector_store %arg4[%c0_12, %c0_13], %13 {strides = array<i32>} : memref<2x128xf32, #tpu.memory_space<vmem>>, vector<2x128xf32>,
    } else {
    }
    return
  }
  func.func @transform_0(%arg0: i32, %arg1: i32, %arg2: i32) -> (i32, i32, i32) {
    %c0_i32 = arith.constant 0 : i32
    return %arg0, %arg2, %arg1 : i32, i32, i32
  }
  func.func @transform_1(%arg0: i32, %arg1: i32, %arg2: i32) -> (i32, i32) {
    %c0_i32 = arith.constant 0 : i32
    return %arg0, %arg1 : i32, i32
  }
}

</mosaic_0001>

<bundles_post_ra>
// kernel: tpu_custom_call.1
= control target key start
LH: loop header
LB: loop body
LE: loop exit
PB: predicated region body
PF: predicated region fallthrough
CT: control target
= control target key end

     0   :  { %6 = vsyncpa [#allocation3], 0  ;;  %s648_s0 = inlined_call_operand.hbm [shape: f32[2,4,256], index: 0, kind: input, shape index: {}]   ;;  %s649_s1 = inlined_call_operand.hbm [shape: f32[2,256], index: 1, kind: output, shape index: {}]  }
   0x1   :  { %8 = vsyncpa [#allocation3 + $0x1], 0 }
   0x2   :  { %9 = vsyncpa [#allocation4], 0 }
   0x3   :  { %11 = vsyncpa [#allocation4 + $0x1], 0  ;;  %s509_s6 = smov 0   ;;  %s511_s7 = smov 0  }
   0x4   :  { %s513_s8 = smov 0   ;;  %s515_s9 = smov 0  }
   0x5   :  { %s517_s10 = smov 0   ;;  %s519_s11 = smov 0  }
   0x6 LB: > { %s304_s12 = sadd.s32 4294967295, %s491_s11   ;;  %s305_s13 = sadd.s32 4294967294, %s491_s11   ;;  %s491_s11 = sphi %s519_s11, %s17_s11   ;;  %s487_s10 = sphi %s517_s10, %s660_s10   ;;  %s483_s9 = sphi %s515_s9, %s659_s9   ;;  %s479_s8 = sphi %s513_s8, %s658_s8   ;;  %s475_s7 = sphi %s511_s7, %s657_s7   ;;  %s471_s6 = sphi %s509_s6, %s656_s6  }
   0x7   : > { %s32_s14 = sadd.s32 1, %s487_s10  ;;  %s47_s15 = sadd.s32 1, %s479_s8 }
   0x8   : > { %p34_p0 = scmp.ge.s32.totalorder %s32_s14, 2  ;;  %p54_p1 = scmp.ne.s32.totalorder %s479_s8, %s475_s7 }
   0x9   : > { %p55_p2 = scmp.eq.s32.totalorder %s491_s11, 0  ;;  %p60_p3 = scmp.ne.s32.totalorder %s475_s7, %s471_s6 }
   0xa   : > { %s662_s14 = smov (%p34_p0, %s32_s14), 0  ;;  %p61_p5 = scmp.eq.s32.totalorder %s304_s12, 0 }
   0xb   : > { %p550_p4 = por %p55_p2, %p54_p1  ;;  %s43_s17 = ssub.s32 %s487_s10, %s662_s14 }
   0xc   : > { %p86_p6 = scmp.eq.s32.totalorder %s304_s12, 1  ;;  %p45_p7 = scmp.eq.s32.totalorder %s43_s17, 0 }
   0xd   : > { %p556_p8 = por %p61_p5, %p60_p3  ;;  %p92_p10 = scmp.eq.s32.totalorder %s305_s13, 1 }
   0xe   : > { %p560_p9 = por %p86_p6, %p54_p1  ;;  %p329_p13 = scmp.lt.s32.totalorder %s491_s11, 2 }
   0xf   : > { %s565_s20 = scalar_select %p45_p7, %s479_s8, %s47_s15  }
  0x10   : > { %p567_p11 = por %p92_p10, %p60_p3  ;;  %s112_s22 = sand.u32 1, %s479_s8  }
  0x11   : > { %s308_s23 = sshll.u32 %s112_s22, 3  ;;  %s309_s24 = sshll.u32 %s487_s10, 6 }
  0x12   : > { %s126_s27 = scalar_lea.hbm %s648_s0, %s309_s24  ;;  %s116_s28 = scalar_lea.vmem [#allocation2], %s308_s23 }
  0x13   : > { %s127_s29 = sshll.u32 %s116_s28, 4  ;;  %p580_p0 = pnand %p329_p13, %p550_p4  ;;  %s128_s29 = int_to_ptr.vmem [resolvable:$true] %s127_s29 }
  0x14   : > { %s113_s2 = scalar_lea.sflag [#allocation3], %s112_s22  ;;  %s396_s3 = scalar_lea.vmem %s128_s29, 128 }
  0x15   : > { %p385_p1 = pneg %p580_p0  ;;  %p397_p2 = scmp.ne.s32.totalorder %s128_s29, %s396_s3 }
  0x16   : > { %s493_s4 = smov [#allocation2]  }
  0x17   : > { %p399_p3 = pnand %p397_p2, %p385_p1  ;;  %s401_s5 = sshll.u32 %s493_s4, 4  ;;  %s402_s5 = int_to_ptr.vmem [resolvable:$false] %s401_s5 }
  0x18   : > { %s403_s12 = scalar_lea.vmem %s402_s5, 256  ;;  %p404_p6 = scmp.lt.s32.totalorder %s128_s29, %s402_s5 }
  0x19   : > { %p400_p5 = pneg %p399_p3  ;;  %p405_p7 = scmp.lt.s32.totalorder %s403_s12, %s396_s3 }
  0x1b   : > { %p406_p10 = por %p405_p7, %p404_p6 }
  0x1d   : > { %p407_p12 = pnand %p406_p10, %p400_p5 }
  0x1f   : > { %410 = shalt.err (!%p407_p12)
}
  0x20   : > { %s494_s13 = smov 128   ;;  %s495_s15 = smov 64  }
  0x21   : > { %s496_s16 = smov 4   ;;  %p310_p4 = scmp.ge.s32.totalorder %s491_s11, 1 }
  0x22   : > { %324 = dma.hbm_to_vmem [thread:$0]  (!%p580_p0), %s126_s27, 128, %s128_s29, %s113_s2, %s494_s13, %s495_s15, %s496_s16  }
  0x23   : > { %p135_p13 = scmp.lt.s32.totalorder %s491_s11, 3 }
  0x25   : > { %p136_p1 = pnand %p310_p4, %p135_p13 }
  0x26   : > { %s591_s17 = sand.u32 (!%p136_p1), 1, %s475_s7  }
  0x27   : > { %139 = sbr.rel (%p136_p1) target bundleno = 86 (0x56), region = 24  ;;  %s311_s22 = sshll.u32 (!%p136_p1), %s591_s17, 3 }
  0x28   : > { %s142_s23 = scalar_lea.sflag (!%p136_p1), [#allocation3], %s591_s17  ;;  %s145_s24 = scalar_lea.vmem (!%p136_p1), [#allocation2], %s311_s22 }
  0x2c   : > { %462 = dma.done.wait (%p556_p8), %s142_s23, 128  }
  0x2d   : > { %464 = vsyncadd (%p556_p8), %s142_s23, 4294967168  ;;  %s312_s25 = sshll.u32 %s591_s17, 1  ;;  %v497_v0 = vmov 0.0   ;;  %vm173_vm0 = vcmask 1043456   ;;  %v170_v1 = vld [vmem:[%s145_s24] sm:$0xf] }
  0x2e   : > { %s600_s26 = scalar_lea.vmem [#allocation5], %s312_s25  ;;  %v171_v2 = vld [vmem:[%s145_s24 + $0x4] sm:$0xf]  ;;  %v174_v3 = vsel %vm173_vm0, %v170_v1, 0.0  ;;  %vm190_vm1 = vcmask 1041409   ;;  %s314_s18 = sshll.u32 %s483_s9, 5 }
  0x2f   : > { %169 = vst [vmem:[%s600_s26] sm:$0x3] %v497_v0  ;;  %v181_v4 = vsel %vm173_vm0, %v171_v2, 0.0  ;;  %v175_v5 = vrot.slane %v174_v3, 4  ;;  %s217_s27 = sshll.u32 %s600_s26, 4  ;;  %s215_s30 = scalar_lea.hbm %s649_s1, %s314_s18  ;;  %s218_s27 = int_to_ptr.vmem [resolvable:$true] %s217_s27 }
  0x30   : > { %v182_v6 = vrot.slane %v181_v4, 4  ;;  %s202_s2 = scalar_lea.sflag [#allocation4], %s591_s17  ;;  %s411_s3 = scalar_lea.vmem %s218_s27, 32 }
  0x31   : > { %v176_v7 = vadd.f32 %v175_v5, %v174_v3  ;;  %p412_p8 = scmp.ne.s32.totalorder %s218_s27, %s411_s3  ;;  %s498_s4 = smov [#allocation5]  }
  0x32   : > { %v183_v8 = vadd.f32 %v182_v6, %v181_v4  ;;  %s415_s5 = sshll.u32 %s498_s4, 4  ;;  %s416_s5 = int_to_ptr.vmem [resolvable:$false] %s415_s5 }
  0x33   : > { %v177_v9 = vrot.slane %v176_v7, 2  ;;  %p413_p12 = pnand %p412_p8, %p560_p9  ;;  %s417_s12 = scalar_lea.vmem %s416_s5, 64 }
  0x34   : > { %v184_v10 = vrot.slane %v183_v8, 2  ;;  %p418_p2 = scmp.lt.s32.totalorder %s218_s27, %s416_s5  ;;  %p419_p3 = scmp.lt.s32.totalorder %s417_s12, %s411_s3 }
  0x35   : > { %v178_v11 = vadd.f32 %v177_v9, %v176_v7  ;;  %p414_p0 = pneg %p413_p12 }
  0x36   : > { %v185_v12 = vadd.f32 %v184_v10, %v183_v8  ;;  %v172_v15 = vld [vmem:[%s600_s26] sm:$0x3]  ;;  %p420_p5 = por %p419_p3, %p418_p2 }
  0x37   : > { %v179_v13 = vrot.slane %v178_v11, 1 }
  0x38   : > { %v186_v14 = vrot.slane %v185_v12, 1  ;;  %p421_p6 = pnand %p420_p5, %p414_p0 }
  0x39   : > { %v180_v16 = vadd.f32 %v179_v13, %v178_v11 }
  0x3a   : > { %v187_v17 = vadd.f32 %v186_v14, %v185_v12 }
  0x3c   : > { %v191_v18 = vsel %vm190_vm1, %v187_v17, %v180_v16 }
  0x3d   : > { %v193_v19 = vadd.f32 %v191_v18, %v172_v15 }
  0x3f   : > { %194 = vst [vmem:[%s600_s26] sm:$0x3] %v193_v19 }
  0x46   : > { %v198_v20 = vld [vmem:[%s600_s26] sm:$0x3] }
  0x47   : > { %v199_v21 = vmul.f32 0.25, %v198_v20 }
  0x49   : > { %200 = vst [vmem:[%s600_s26] sm:$0x3] %v199_v21 }
  0x4a   : > { %424 = shalt.err (!%p421_p6)
}
  0x4b   : > { %s425_s9 = scalar_lea.hbm %s215_s30, 32  ;;  %s429_s16 = scalar_lea.hbm %s649_s1, 64 }
  0x4c   : > { %p426_p7 = scmp.ne.s32.totalorder %s215_s30, %s425_s9  ;;  %p430_p13 = scmp.lt.s32.totalorder %s215_s30, %s649_s1 }
  0x4d   : > { %p431_p1 = scmp.lt.s32.totalorder %s429_s16, %s425_s9 }
  0x4e   : > { %p427_p10 = pnand %p426_p7, %p560_p9 }
  0x4f   : > { %p432_p8 = por %p431_p1, %p430_p13 }
  0x50   : > { %p428_p4 = pneg %p427_p10 }
  0x52   : > { %p433_p12 = pnand %p432_p8, %p428_p4 }
  0x54   : > { %436 = shalt.err (!%p433_p12)
}
  0x55   : > { %319 = dma.vmem_to_hbm [thread:$0]  (%p560_p9), %s218_s27, 32, %s215_s30, %s202_s2  }
  0x56 PF: > { %s229_s23 = sand.u32 1, %s471_s6   ;;  %p655_p0 = scmp.ge.s32.totalorder %s491_s11, 2 }
  0x57   : > { %s230_s24 = scalar_lea.sflag [#allocation4], %s229_s23 }
  0x58   : > { %p326_p2 = pnand %p655_p0, %p567_p11 }
  0x5a   : > { %p327_p3 = pneg %p326_p2 }
  0x5c   : > { %466 = dma.done.wait (%p327_p3), %s230_s24, 32  }
  0x5d   : > { %468 = vsyncadd (%p327_p3), %s230_s24, 4294967264  ;;  %s17_s11 = sadd.s32 1, %s491_s11   ;;  %s656_s6 = smov %s475_s7 }
  0x5e   : > { %p14_p5 = scmp.ge.s32.totalorder %s17_s11, 4   ;;  %s657_s7 = smov %s479_s8 }
  0x5f   : > { %s658_s8 = smov %s565_s20  ;;  %s659_s9 = smov %s487_s10 }
  0x60   : > { %s660_s10 = smov %s662_s14  ;;  %16 = sbr.rel (!%p14_p5) target bundleno = 6 (0x6), region = 77 }
  0x65   :  { %235 = vsyncpa [#allocation3], 1 }
  0x66   :  { %237 = vsyncpa [#allocation3 + $0x1], 1 }
  0x67   :  { %238 = vsyncpa [#allocation4], 1 }
  0x68   :  { %240 = vsyncpa [#allocation4 + $0x1], 1 }

</bundles_post_ra>
